<compile_context>
chip_gen: v7x
topology: tpu7x:2x2x1
jax: 0.10.0
libtpu: 0.0.40
codegen_flags: <defaults>
</compile_context>

<pallas_src>
import functools
import math

import jax
import jax.numpy as jnp
from jax import lax
from jax.experimental import pallas as pl
from jax.experimental.pallas import tpu as pltpu


# --------------------------------------------------------------------------
# Fused encoder layer kernel.  Grid: (B,) "parallel"; one batch row per step.
# --------------------------------------------------------------------------
def _encoder_layer_kernel(x_ref, m_ref,
                          wqkv_ref, bqkv_ref, wo_ref, bo_ref,
                          g1_ref, be1_ref,
                          w1_ref, b1_ref, w2_ref, b2_ref,
                          g2_ref, be2_ref,
                          y_ref, a_ref,
                          ctx_ref, *, n_heads, scale, eps):
    x = x_ref[0]                                   # (S, D) f32
    S, D = x.shape
    dh = D // n_heads

    # ---- fused QKV projection (bf16 MXU, f32 accumulate) ----
    qkv = jnp.dot(x.astype(jnp.bfloat16), wqkv_ref[...],
                  preferred_element_type=jnp.float32) + bqkv_ref[...]   # (S, 3D)

    # key-pad additive mask, hoisted out of the head loop (f32)
    neg_mask = (-1e9) * m_ref[0]                   # (1, S)

    for h in range(n_heads):                       # static unroll, heads in-kernel
        qh = qkv[:, h * dh:(h + 1) * dh].astype(jnp.bfloat16)
        kh = qkv[:, D + h * dh:D + (h + 1) * dh].astype(jnp.bfloat16)
        vh = qkv[:, 2 * D + h * dh:2 * D + (h + 1) * dh].astype(jnp.bfloat16)

        # q @ k^T without an explicit transpose (contract last dims on MXU)
        s = lax.dot_general(qh, kh, (((1,), (1,)), ((), ())),
                            preferred_element_type=jnp.float32) * scale  # (S, S)
        s = s + neg_mask
        s = s - jnp.max(s, axis=-1, keepdims=True)
        p = jnp.exp(s)
        p = p * pl.reciprocal(jnp.sum(p, axis=-1, keepdims=True), approx=True)
        a_ref[0, h] = p                             # returned attention probs

        # per-head context into a VMEM scratch column slab so the out-proj is
        # ONE (S,D)@(D,D) matmul with full MXU K instead of H small-K matmuls.
        ctx_ref[:, h * dh:(h + 1) * dh] = jnp.dot(
            p.astype(jnp.bfloat16), vh, preferred_element_type=jnp.float32)

    o = jnp.dot(ctx_ref[...].astype(jnp.bfloat16), wo_ref[...],
                preferred_element_type=jnp.float32) + bo_ref[...]        # (S, D)

    # ---- residual + LayerNorm1 (f32) ----
    r = x + o
    mu = jnp.mean(r, axis=-1, keepdims=True)
    var = jnp.mean((r - mu) ** 2, axis=-1, keepdims=True)
    h1 = (r - mu) * lax.rsqrt(var + eps) * g1_ref[...] + be1_ref[...]

    # ---- FFN: W1 + ReLU + W2 (bf16 MXU); (S, FF) stays in VMEM ----
    f = jnp.dot(h1.astype(jnp.bfloat16), w1_ref[...],
                preferred_element_type=jnp.float32) + b1_ref[...]        # (S, FF)
    f = jnp.maximum(f, 0.0)
    y = jnp.dot(f.astype(jnp.bfloat16), w2_ref[...],
                preferred_element_type=jnp.float32) + b2_ref[...]        # (S, D)

    # ---- residual + LayerNorm2 (f32) ----
    r2 = h1 + y
    mu2 = jnp.mean(r2, axis=-1, keepdims=True)
    var2 = jnp.mean((r2 - mu2) ** 2, axis=-1, keepdims=True)
    y_ref[0] = (r2 - mu2) * lax.rsqrt(var2 + eps) * g2_ref[...] + be2_ref[...]


def encoder_layer(x, keypad, p, n_heads, eps=1e-5):
    B, S, D = x.shape
    FF = p["w_ff1"].shape[1]
    dh = D // n_heads
    scale = 1.0 / math.sqrt(dh)

    def full(shp):
        return pl.BlockSpec(shp, lambda b: (0,) * len(shp))

    def bf16(w):
        return w.astype(jnp.bfloat16)

    y, attn = pl.pallas_call(
        functools.partial(_encoder_layer_kernel,
                          n_heads=n_heads, scale=scale, eps=eps),
        grid=(B,),
        in_specs=[pl.BlockSpec((1, S, D), lambda b: (b, 0, 0)),
                  pl.BlockSpec((1, 1, S), lambda b: (b, 0, 0)),
                  full((D, 3 * D)), full((1, 3 * D)),
                  full((D, D)), full((1, D)),
                  full((1, D)), full((1, D)),
                  full((D, FF)), full((1, FF)),
                  full((FF, D)), full((1, D)),
                  full((1, D)), full((1, D))],
        out_specs=(pl.BlockSpec((1, S, D), lambda b: (b, 0, 0)),
                   pl.BlockSpec((1, n_heads, S, S), lambda b: (b, 0, 0, 0))),
        out_shape=(jax.ShapeDtypeStruct((B, S, D), jnp.float32),
                   jax.ShapeDtypeStruct((B, n_heads, S, S), jnp.float32)),
        scratch_shapes=[pltpu.VMEM((S, D), jnp.float32)],
        compiler_params=pltpu.CompilerParams(dimension_semantics=("parallel",)),
    )(x, keypad,
      bf16(p["w_qkv"]), p["b_qkv"].reshape(1, -1),
      bf16(p["w_o"]), p["b_o"].reshape(1, -1),
      p["ln1_g"].reshape(1, -1), p["ln1_b"].reshape(1, -1),
      bf16(p["w_ff1"]), p["b_ff1"].reshape(1, -1),
      bf16(p["w_ff2"]), p["b_ff2"].reshape(1, -1),
      p["ln2_g"].reshape(1, -1), p["ln2_b"].reshape(1, -1))
    return y, attn


# --------------------------------------------------------------------------
# Fused mean-pool over seq + generator linear + softmax (tiny output head).
# Grid: (B,) "parallel"; exact divide for the classifier softmax.
# --------------------------------------------------------------------------
def _pool_generator_kernel(x_ref, w_ref, b_ref, o_ref):
    x = x_ref[0]                                      # (S, D)
    pooled = jnp.mean(x, axis=0, keepdims=True)       # torch.mean(enc_out, dim=1)
    logits = jnp.dot(pooled, w_ref[...],
                     preferred_element_type=jnp.float32) + b_ref[...]   # (1, C)
    logits = logits - jnp.max(logits, axis=-1, keepdims=True)
    e = jnp.exp(logits)
    o_ref[...] = e / jnp.sum(e, axis=-1, keepdims=True)


def pool_and_generate(enc_out, w, b):
    B, S, D = enc_out.shape
    C = w.shape[1]
    return pl.pallas_call(
        _pool_generator_kernel,
        grid=(B,),
        in_specs=[pl.BlockSpec((1, S, D), lambda b: (b, 0, 0)),
                  pl.BlockSpec((D, C), lambda b: (0, 0)),
                  pl.BlockSpec((1, C), lambda b: (0, 0))],
        out_specs=pl.BlockSpec((1, C), lambda b: (b, 0)),
        out_shape=jax.ShapeDtypeStruct((B, C), jnp.float32),
        compiler_params=pltpu.CompilerParams(dimension_semantics=("parallel",)),
    )(enc_out, w, b.reshape(1, C))


# ------------------------------- JAX glue ---------------------------------
def sinusoidal_pos(max_len, d_model):
    pos = jnp.arange(max_len, dtype=jnp.float32)[:, None]
    i = jnp.arange(0, d_model, 2, dtype=jnp.float32)
    div = jnp.exp(-math.log(10000.0) * i / d_model)
    pe = jnp.zeros((max_len, d_model), jnp.float32)
    pe = pe.at[:, 0::2].set(jnp.sin(pos * div))
    pe = pe.at[:, 1::2].set(jnp.cos(pos * div))
    return pe


def embed(src, tok_emb, pos_emb, d_model):
    # Embedding gather stays in JAX (table lookup, no dense Pallas win here).
    x = jnp.take(tok_emb, src, axis=0) * math.sqrt(d_model)
    return x + pos_emb[None, : src.shape[1], :]


def test_model_forward(src, params, n_heads, pad_idx):
    # Key-pad row only: (B, 1, S) — the (B, H, S, S) mask of make_enc_mask is
    # identical across heads/query rows and is broadcast inside the kernel.
    keypad = (src == pad_idx).astype(jnp.float32)[:, None, :]
    x = embed(src, params["tok_emb"], params["pos_emb"], params["d_model"])
    atten_encs = []
    for layer in params["layers"]:
        x, attn = encoder_layer(x, keypad, layer, n_heads)
        atten_encs.append(attn)
    out_prob = pool_and_generate(x, params["gen_w"], params["gen_b"])
    return out_prob, atten_encs
    # TODO(synk): discretize_outputs references an undefined self.fc and is not
    # used in forward(); intentionally not implemented.


def init_params(key, vocab, d_model, n_heads, d_ff, n_layers, n_classes, max_len=64):
    def nrm(k, shape, scale=0.02):
        return scale * jax.random.normal(k, shape, dtype=jnp.float32)

    keys = iter(jax.random.split(key, 4 + 4 * n_layers))
    params = {
        "d_model": d_model,
        "tok_emb": nrm(next(keys), (vocab, d_model)),
        "pos_emb": sinusoidal_pos(max_len, d_model),
        "gen_w": nrm(next(keys), (d_model, n_classes)),
        "gen_b": jnp.zeros((n_classes,), jnp.float32),
        "layers": [],
    }
    for _ in range(n_layers):
        params["layers"].append({
            "w_qkv": nrm(next(keys), (d_model, 3 * d_model)),
            "b_qkv": jnp.zeros((3 * d_model,), jnp.float32),
            "w_o": nrm(next(keys), (d_model, d_model)),
            "b_o": jnp.zeros((d_model,), jnp.float32),
            "w_ff1": nrm(next(keys), (d_model, d_ff)),
            "b_ff1": jnp.zeros((d_ff,), jnp.float32),
            "w_ff2": nrm(next(keys), (d_ff, d_model)),
            "b_ff2": jnp.zeros((d_model,), jnp.float32),
            "ln1_g": jnp.ones((d_model,), jnp.float32),
            "ln1_b": jnp.zeros((d_model,), jnp.float32),
            "ln2_g": jnp.ones((d_model,), jnp.float32),
            "ln2_b": jnp.zeros((d_model,), jnp.float32),
        })
    return params


if __name__ == "__main__":
    B, S, D, H, V, C, FF, L = 2, 8, 32, 4, 16, 4, 64, 2
    pad_idx = 0

    key = jax.random.PRNGKey(0)
    k_src, k_par = jax.random.split(key)

    src = jax.random.randint(k_src, (B, S), 1, V, dtype=jnp.int32)
    src = src.at[0, -2:].set(pad_idx)          # give batch 0 some padding
    src = src.at[1, -3:].set(pad_idx)          # give batch 1 some padding

    params = init_params(k_par, V, D, H, FF, L, C)

    out_prob, atten_encs = test_model_forward(src, params, H, pad_idx)
    jax.block_until_ready(out_prob)
    jax.block_until_ready(atten_encs)

    assert out_prob.shape == (B, C)
    assert len(atten_encs) == L and atten_encs[0].shape == (B, H, S, S)
    assert bool(jnp.all(jnp.isfinite(out_prob)))
    print("KERNEL_OK")
</pallas_src>

<mosaic_0001>
module attributes {stable_mosaic.version = 11 : i64} {
  func.func @_encoder_layer_kernel(%arg0: i32, %arg1: memref<1x8x32xf32, #tpu.memory_space<vmem>>, %arg2: memref<1x1x8xf32, #tpu.memory_space<vmem>>, %arg3: memref<32x96xbf16, #tpu.memory_space<vmem>>, %arg4: memref<1x96xf32, #tpu.memory_space<vmem>>, %arg5: memref<32x32xbf16, #tpu.memory_space<vmem>>, %arg6: memref<1x32xf32, #tpu.memory_space<vmem>>, %arg7: memref<1x32xf32, #tpu.memory_space<vmem>>, %arg8: memref<1x32xf32, #tpu.memory_space<vmem>>, %arg9: memref<32x64xbf16, #tpu.memory_space<vmem>>, %arg10: memref<1x64xf32, #tpu.memory_space<vmem>>, %arg11: memref<64x32xbf16, #tpu.memory_space<vmem>>, %arg12: memref<1x32xf32, #tpu.memory_space<vmem>>, %arg13: memref<1x32xf32, #tpu.memory_space<vmem>>, %arg14: memref<1x32xf32, #tpu.memory_space<vmem>>, %arg15: memref<1x8x32xf32, #tpu.memory_space<vmem>>, %arg16: memref<1x4x8x8xf32, #tpu.memory_space<vmem>>, %arg17: memref<8x32xf32, #tpu.memory_space<vmem>>) attributes {dimension_semantics = [#tpu.dimension_semantics<parallel>], iteration_bounds = array<i64: 2>, scalar_prefetch = 0 : i64, scratch_operands = 1 : i64, tpu.core_type = #tpu.core_type<tc>, window_params = [{transform_indices = @transform_0, window_bounds = array<i64: 1, 8, 32>}, {transform_indices = @transform_1, window_bounds = array<i64: 1, 1, 8>}, {pipeline_mode = #tpu.pipeline_mode<synchronous>, transform_indices = @transform_2, window_bounds = array<i64: 32, 96>}, {pipeline_mode = #tpu.pipeline_mode<synchronous>, transform_indices = @transform_3, window_bounds = array<i64: 1, 96>}, {pipeline_mode = #tpu.pipeline_mode<synchronous>, transform_indices = @transform_4, window_bounds = array<i64: 32, 32>}, {pipeline_mode = #tpu.pipeline_mode<synchronous>, transform_indices = @transform_5, window_bounds = array<i64: 1, 32>}, {pipeline_mode = #tpu.pipeline_mode<synchronous>, transform_indices = @transform_6, window_bounds = array<i64: 1, 32>}, {pipeline_mode = #tpu.pipeline_mode<synchronous>, transform_indices = @transform_7, window_bounds = array<i64: 1, 32>}, {pipeline_mode = #tpu.pipeline_mode<synchronous>, transform_indices = @transform_8, window_bounds = array<i64: 32, 64>}, {pipeline_mode = #tpu.pipeline_mode<synchronous>, transform_indices = @transform_9, window_bounds = array<i64: 1, 64>}, {pipeline_mode = #tpu.pipeline_mode<synchronous>, transform_indices = @transform_10, window_bounds = array<i64: 64, 32>}, {pipeline_mode = #tpu.pipeline_mode<synchronous>, transform_indices = @transform_11, window_bounds = array<i64: 1, 32>}, {pipeline_mode = #tpu.pipeline_mode<synchronous>, transform_indices = @transform_12, window_bounds = array<i64: 1, 32>}, {pipeline_mode = #tpu.pipeline_mode<synchronous>, transform_indices = @transform_13, window_bounds = array<i64: 1, 32>}, {transform_indices = @transform_14, window_bounds = array<i64: 1, 8, 32>}, {transform_indices = @transform_15, window_bounds = array<i64: 1, 4, 8, 8>}]} {
    %c0 = arith.constant 0 : index
    %c0_0 = arith.constant 0 : index
    %c0_1 = arith.constant 0 : index
    %0 = vector.load %arg1[%c0, %c0_0, %c0_1] : memref<1x8x32xf32, #tpu.memory_space<vmem>>, vector<1x8x32xf32>
    %1 = vector.shape_cast %0 : vector<1x8x32xf32> to vector<8x32xf32>
    %2 = arith.truncf %1 : vector<8x32xf32> to vector<8x32xbf16>
    %c0_2 = arith.constant 0 : index
    %c0_3 = arith.constant 0 : index
    %3 = vector.load %arg3[%c0_2, %c0_3] : memref<32x96xbf16, #tpu.memory_space<vmem>>, vector<32x96xbf16>
    %cst = arith.constant dense<0.000000e+00> : vector<8x96xf32>
    %4 = tpu.matmul %2, %3, %cst {dimension_numbers = #tpu.dot_dimension_numbers<[1], [0], [0], [1], [0, 0, 1, 1], [], []>} : vector<8x32xbf16>, vector<32x96xbf16>, vector<8x96xf32> -> vector<8x96xf32>
    %c0_4 = arith.constant 0 : index
    %c0_5 = arith.constant 0 : index
    %5 = vector.load %arg4[%c0_4, %c0_5] : memref<1x96xf32, #tpu.memory_space<vmem>>, vector<1x96xf32>
    %6 = vector.broadcast %5 : vector<1x96xf32> to vector<8x96xf32>
    %7 = arith.addf %4, %6 : vector<8x96xf32>
    %c0_6 = arith.constant 0 : index
    %c0_7 = arith.constant 0 : index
    %c0_8 = arith.constant 0 : index
    %8 = vector.load %arg2[%c0_6, %c0_7, %c0_8] : memref<1x1x8xf32, #tpu.memory_space<vmem>>, vector<1x1x8xf32>
    %9 = vector.shape_cast %8 : vector<1x1x8xf32> to vector<1x8xf32>
    %cst_9 = arith.constant -1.000000e+09 : f32
    %10 = vector.broadcast %cst_9 : f32 to vector<1x8xf32>
    %11 = arith.mulf %10, %9 : vector<1x8xf32>
    %12 = vector.extract_strided_slice %7 {offsets = [0, 0], sizes = [8, 8], strides = [1, 1]} : vector<8x96xf32> to vector<8x8xf32>
    %13 = arith.truncf %12 : vector<8x8xf32> to vector<8x8xbf16>
    %14 = vector.extract_strided_slice %7 {offsets = [0, 32], sizes = [8, 8], strides = [1, 1]} : vector<8x96xf32> to vector<8x8xf32>
    %15 = arith.truncf %14 : vector<8x8xf32> to vector<8x8xbf16>
    %16 = vector.extract_strided_slice %7 {offsets = [0, 64], sizes = [8, 8], strides = [1, 1]} : vector<8x96xf32> to vector<8x8xf32>
    %17 = arith.truncf %16 : vector<8x8xf32> to vector<8x8xbf16>
    %cst_10 = arith.constant dense<0.000000e+00> : vector<8x8xf32>
    %18 = tpu.matmul %13, %15, %cst_10 {dimension_numbers = #tpu.dot_dimension_numbers<[1], [1], [0], [0], [0, 0, 1, 0], [], []>} : vector<8x8xbf16>, vector<8x8xbf16>, vector<8x8xf32> -> vector<8x8xf32>
    %cst_11 = arith.constant 0.353553385 : f32
    %19 = vector.broadcast %cst_11 : f32 to vector<8x8xf32>
    %20 = arith.mulf %18, %19 : vector<8x8xf32>
    %21 = vector.broadcast %11 : vector<1x8xf32> to vector<8x8xf32>
    %22 = arith.addf %20, %21 : vector<8x8xf32>
    %cst_12 = arith.constant dense<0xFF800000> : vector<8xf32>
    %23 = vector.multi_reduction <maximumf>, %22, %cst_12 [1] : vector<8x8xf32> to vector<8xf32>
    %24 = vector.shape_cast %23 : vector<8xf32> to vector<8x1xf32>
    %25 = vector.broadcast %24 : vector<8x1xf32> to vector<8x8xf32>
    %26 = arith.subf %22, %25 : vector<8x8xf32>
    %27 = math.exp %26 : vector<8x8xf32>
    %cst_13 = arith.constant dense<0.000000e+00> : vector<8xf32>
    %28 = vector.multi_reduction <add>, %27, %cst_13 [1] : vector<8x8xf32> to vector<8xf32>
    %29 = vector.shape_cast %28 : vector<8xf32> to vector<8x1xf32>
    %30 = tpu.reciprocal %29 {approx = true} : vector<8x1xf32> -> vector<8x1xf32>
    %31 = vector.broadcast %30 : vector<8x1xf32> to vector<8x8xf32>
    %32 = arith.mulf %27, %31 : vector<8x8xf32>
    %c0_14 = arith.constant 0 : index
    %c0_15 = arith.constant 0 : index
    %c0_16 = arith.constant 0 : index
    %c0_17 = arith.constant 0 : index
    %33 = vector.load %arg16[%c0_14, %c0_15, %c0_16, %c0_17] : memref<1x4x8x8xf32, #tpu.memory_space<vmem>>, vector<1x1x8x8xf32>
    %34 = vector.shape_cast %33 : vector<1x1x8x8xf32> to vector<8x8xf32>
    %35 = vector.shape_cast %32 : vector<8x8xf32> to vector<1x1x8x8xf32>
    tpu.vector_store %arg16[%c0_14, %c0_15, %c0_16, %c0_17], %35 {strides = array<i32>} : memref<1x4x8x8xf32, #tpu.memory_space<vmem>>, vector<1x1x8x8xf32>,
    %36 = arith.truncf %32 : vector<8x8xf32> to vector<8x8xbf16>
    %cst_18 = arith.constant dense<0.000000e+00> : vector<8x8xf32>
    %37 = tpu.matmul %36, %17, %cst_18 {dimension_numbers = #tpu.dot_dimension_numbers<[1], [0], [0], [1], [0, 0, 1, 1], [], []>} : vector<8x8xbf16>, vector<8x8xbf16>, vector<8x8xf32> -> vector<8x8xf32>
    %c0_19 = arith.constant 0 : index
    %c0_20 = arith.constant 0 : index
    %38 = vector.load %arg17[%c0_19, %c0_20] : memref<8x32xf32, #tpu.memory_space<vmem>>, vector<8x8xf32>
    tpu.vector_store %arg17[%c0_19, %c0_20], %37 {strides = array<i32>} : memref<8x32xf32, #tpu.memory_space<vmem>>, vector<8x8xf32>,
    %39 = vector.extract_strided_slice %7 {offsets = [0, 8], sizes = [8, 8], strides = [1, 1]} : vector<8x96xf32> to vector<8x8xf32>
    %40 = arith.truncf %39 : vector<8x8xf32> to vector<8x8xbf16>
    %41 = vector.extract_strided_slice %7 {offsets = [0, 40], sizes = [8, 8], strides = [1, 1]} : vector<8x96xf32> to vector<8x8xf32>
    %42 = arith.truncf %41 : vector<8x8xf32> to vector<8x8xbf16>
    %43 = vector.extract_strided_slice %7 {offsets = [0, 72], sizes = [8, 8], strides = [1, 1]} : vector<8x96xf32> to vector<8x8xf32>
    %44 = arith.truncf %43 : vector<8x8xf32> to vector<8x8xbf16>
    %cst_21 = arith.constant dense<0.000000e+00> : vector<8x8xf32>
    %45 = tpu.matmul %40, %42, %cst_21 {dimension_numbers = #tpu.dot_dimension_numbers<[1], [1], [0], [0], [0, 0, 1, 0], [], []>} : vector<8x8xbf16>, vector<8x8xbf16>, vector<8x8xf32> -> vector<8x8xf32>
    %cst_22 = arith.constant 0.353553385 : f32
    %46 = vector.broadcast %cst_22 : f32 to vector<8x8xf32>
    %47 = arith.mulf %45, %46 : vector<8x8xf32>
    %48 = vector.broadcast %11 : vector<1x8xf32> to vector<8x8xf32>
    %49 = arith.addf %47, %48 : vector<8x8xf32>
    %cst_23 = arith.constant dense<0xFF800000> : vector<8xf32>
    %50 = vector.multi_reduction <maximumf>, %49, %cst_23 [1] : vector<8x8xf32> to vector<8xf32>
    %51 = vector.shape_cast %50 : vector<8xf32> to vector<8x1xf32>
    %52 = vector.broadcast %51 : vector<8x1xf32> to vector<8x8xf32>
    %53 = arith.subf %49, %52 : vector<8x8xf32>
    %54 = math.exp %53 : vector<8x8xf32>
    %cst_24 = arith.constant dense<0.000000e+00> : vector<8xf32>
    %55 = vector.multi_reduction <add>, %54, %cst_24 [1] : vector<8x8xf32> to vector<8xf32>
    %56 = vector.shape_cast %55 : vector<8xf32> to vector<8x1xf32>
    %57 = tpu.reciprocal %56 {approx = true} : vector<8x1xf32> -> vector<8x1xf32>
    %58 = vector.broadcast %57 : vector<8x1xf32> to vector<8x8xf32>
    %59 = arith.mulf %54, %58 : vector<8x8xf32>
    %c0_25 = arith.constant 0 : index
    %c1 = arith.constant 1 : index
    %c0_26 = arith.constant 0 : index
    %c0_27 = arith.constant 0 : index
    %60 = vector.load %arg16[%c0_25, %c1, %c0_26, %c0_27] : memref<1x4x8x8xf32, #tpu.memory_space<vmem>>, vector<1x1x8x8xf32>
    %61 = vector.shape_cast %60 : vector<1x1x8x8xf32> to vector<8x8xf32>
    %62 = vector.shape_cast %59 : vector<8x8xf32> to vector<1x1x8x8xf32>
    tpu.vector_store %arg16[%c0_25, %c1, %c0_26, %c0_27], %62 {strides = array<i32>} : memref<1x4x8x8xf32, #tpu.memory_space<vmem>>, vector<1x1x8x8xf32>,
    %63 = arith.truncf %59 : vector<8x8xf32> to vector<8x8xbf16>
    %cst_28 = arith.constant dense<0.000000e+00> : vector<8x8xf32>
    %64 = tpu.matmul %63, %44, %cst_28 {dimension_numbers = #tpu.dot_dimension_numbers<[1], [0], [0], [1], [0, 0, 1, 1], [], []>} : vector<8x8xbf16>, vector<8x8xbf16>, vector<8x8xf32> -> vector<8x8xf32>
    %c0_29 = arith.constant 0 : index
    %c8 = arith.constant 8 : index
    %65 = vector.load %arg17[%c0_29, %c8] : memref<8x32xf32, #tpu.memory_space<vmem>>, vector<8x8xf32>
    tpu.vector_store %arg17[%c0_29, %c8], %64 {strides = array<i32>} : memref<8x32xf32, #tpu.memory_space<vmem>>, vector<8x8xf32>,
    %66 = vector.extract_strided_slice %7 {offsets = [0, 16], sizes = [8, 8], strides = [1, 1]} : vector<8x96xf32> to vector<8x8xf32>
    %67 = arith.truncf %66 : vector<8x8xf32> to vector<8x8xbf16>
    %68 = vector.extract_strided_slice %7 {offsets = [0, 48], sizes = [8, 8], strides = [1, 1]} : vector<8x96xf32> to vector<8x8xf32>
    %69 = arith.truncf %68 : vector<8x8xf32> to vector<8x8xbf16>
    %70 = vector.extract_strided_slice %7 {offsets = [0, 80], sizes = [8, 8], strides = [1, 1]} : vector<8x96xf32> to vector<8x8xf32>
    %71 = arith.truncf %70 : vector<8x8xf32> to vector<8x8xbf16>
    %cst_30 = arith.constant dense<0.000000e+00> : vector<8x8xf32>
    %72 = tpu.matmul %67, %69, %cst_30 {dimension_numbers = #tpu.dot_dimension_numbers<[1], [1], [0], [0], [0, 0, 1, 0], [], []>} : vector<8x8xbf16>, vector<8x8xbf16>, vector<8x8xf32> -> vector<8x8xf32>
    %cst_31 = arith.constant 0.353553385 : f32
    %73 = vector.broadcast %cst_31 : f32 to vector<8x8xf32>
    %74 = arith.mulf %72, %73 : vector<8x8xf32>
    %75 = vector.broadcast %11 : vector<1x8xf32> to vector<8x8xf32>
    %76 = arith.addf %74, %75 : vector<8x8xf32>
    %cst_32 = arith.constant dense<0xFF800000> : vector<8xf32>
    %77 = vector.multi_reduction <maximumf>, %76, %cst_32 [1] : vector<8x8xf32> to vector<8xf32>
    %78 = vector.shape_cast %77 : vector<8xf32> to vector<8x1xf32>
    %79 = vector.broadcast %78 : vector<8x1xf32> to vector<8x8xf32>
    %80 = arith.subf %76, %79 : vector<8x8xf32>
    %81 = math.exp %80 : vector<8x8xf32>
    %cst_33 = arith.constant dense<0.000000e+00> : vector<8xf32>
    %82 = vector.multi_reduction <add>, %81, %cst_33 [1] : vector<8x8xf32> to vector<8xf32>
    %83 = vector.shape_cast %82 : vector<8xf32> to vector<8x1xf32>
    %84 = tpu.reciprocal %83 {approx = true} : vector<8x1xf32> -> vector<8x1xf32>
    %85 = vector.broadcast %84 : vector<8x1xf32> to vector<8x8xf32>
    %86 = arith.mulf %81, %85 : vector<8x8xf32>
    %c0_34 = arith.constant 0 : index
    %c2 = arith.constant 2 : index
    %c0_35 = arith.constant 0 : index
    %c0_36 = arith.constant 0 : index
    %87 = vector.load %arg16[%c0_34, %c2, %c0_35, %c0_36] : memref<1x4x8x8xf32, #tpu.memory_space<vmem>>, vector<1x1x8x8xf32>
    %88 = vector.shape_cast %87 : vector<1x1x8x8xf32> to vector<8x8xf32>
    %89 = vector.shape_cast %86 : vector<8x8xf32> to vector<1x1x8x8xf32>
    tpu.vector_store %arg16[%c0_34, %c2, %c0_35, %c0_36], %89 {strides = array<i32>} : memref<1x4x8x8xf32, #tpu.memory_space<vmem>>, vector<1x1x8x8xf32>,
    %90 = arith.truncf %86 : vector<8x8xf32> to vector<8x8xbf16>
    %cst_37 = arith.constant dense<0.000000e+00> : vector<8x8xf32>
    %91 = tpu.matmul %90, %71, %cst_37 {dimension_numbers = #tpu.dot_dimension_numbers<[1], [0], [0], [1], [0, 0, 1, 1], [], []>} : vector<8x8xbf16>, vector<8x8xbf16>, vector<8x8xf32> -> vector<8x8xf32>
    %c0_38 = arith.constant 0 : index
    %c16 = arith.constant 16 : index
    %92 = vector.load %arg17[%c0_38, %c16] : memref<8x32xf32, #tpu.memory_space<vmem>>, vector<8x8xf32>
    tpu.vector_store %arg17[%c0_38, %c16], %91 {strides = array<i32>} : memref<8x32xf32, #tpu.memory_space<vmem>>, vector<8x8xf32>,
    %93 = vector.extract_strided_slice %7 {offsets = [0, 24], sizes = [8, 8], strides = [1, 1]} : vector<8x96xf32> to vector<8x8xf32>
    %94 = arith.truncf %93 : vector<8x8xf32> to vector<8x8xbf16>
    %95 = vector.extract_strided_slice %7 {offsets = [0, 56], sizes = [8, 8], strides = [1, 1]} : vector<8x96xf32> to vector<8x8xf32>
    %96 = arith.truncf %95 : vector<8x8xf32> to vector<8x8xbf16>
    %97 = vector.extract_strided_slice %7 {offsets = [0, 88], sizes = [8, 8], strides = [1, 1]} : vector<8x96xf32> to vector<8x8xf32>
    %98 = arith.truncf %97 : vector<8x8xf32> to vector<8x8xbf16>
    %cst_39 = arith.constant dense<0.000000e+00> : vector<8x8xf32>
    %99 = tpu.matmul %94, %96, %cst_39 {dimension_numbers = #tpu.dot_dimension_numbers<[1], [1], [0], [0], [0, 0, 1, 0], [], []>} : vector<8x8xbf16>, vector<8x8xbf16>, vector<8x8xf32> -> vector<8x8xf32>
    %cst_40 = arith.constant 0.353553385 : f32
    %100 = vector.broadcast %cst_40 : f32 to vector<8x8xf32>
    %101 = arith.mulf %99, %100 : vector<8x8xf32>
    %102 = vector.broadcast %11 : vector<1x8xf32> to vector<8x8xf32>
    %103 = arith.addf %101, %102 : vector<8x8xf32>
    %cst_41 = arith.constant dense<0xFF800000> : vector<8xf32>
    %104 = vector.multi_reduction <maximumf>, %103, %cst_41 [1] : vector<8x8xf32> to vector<8xf32>
    %105 = vector.shape_cast %104 : vector<8xf32> to vector<8x1xf32>
    %106 = vector.broadcast %105 : vector<8x1xf32> to vector<8x8xf32>
    %107 = arith.subf %103, %106 : vector<8x8xf32>
    %108 = math.exp %107 : vector<8x8xf32>
    %cst_42 = arith.constant dense<0.000000e+00> : vector<8xf32>
    %109 = vector.multi_reduction <add>, %108, %cst_42 [1] : vector<8x8xf32> to vector<8xf32>
    %110 = vector.shape_cast %109 : vector<8xf32> to vector<8x1xf32>
    %111 = tpu.reciprocal %110 {approx = true} : vector<8x1xf32> -> vector<8x1xf32>
    %112 = vector.broadcast %111 : vector<8x1xf32> to vector<8x8xf32>
    %113 = arith.mulf %108, %112 : vector<8x8xf32>
    %c0_43 = arith.constant 0 : index
    %c3 = arith.constant 3 : index
    %c0_44 = arith.constant 0 : index
    %c0_45 = arith.constant 0 : index
    %114 = vector.load %arg16[%c0_43, %c3, %c0_44, %c0_45] : memref<1x4x8x8xf32, #tpu.memory_space<vmem>>, vector<1x1x8x8xf32>
    %115 = vector.shape_cast %114 : vector<1x1x8x8xf32> to vector<8x8xf32>
    %116 = vector.shape_cast %113 : vector<8x8xf32> to vector<1x1x8x8xf32>
    tpu.vector_store %arg16[%c0_43, %c3, %c0_44, %c0_45], %116 {strides = array<i32>} : memref<1x4x8x8xf32, #tpu.memory_space<vmem>>, vector<1x1x8x8xf32>,
    %117 = arith.truncf %113 : vector<8x8xf32> to vector<8x8xbf16>
    %cst_46 = arith.constant dense<0.000000e+00> : vector<8x8xf32>
    %118 = tpu.matmul %117, %98, %cst_46 {dimension_numbers = #tpu.dot_dimension_numbers<[1], [0], [0], [1], [0, 0, 1, 1], [], []>} : vector<8x8xbf16>, vector<8x8xbf16>, vector<8x8xf32> -> vector<8x8xf32>
    %c0_47 = arith.constant 0 : index
    %c24 = arith.constant 24 : index
    %119 = vector.load %arg17[%c0_47, %c24] : memref<8x32xf32, #tpu.memory_space<vmem>>, vector<8x8xf32>
    tpu.vector_store %arg17[%c0_47, %c24], %118 {strides = array<i32>} : memref<8x32xf32, #tpu.memory_space<vmem>>, vector<8x8xf32>,
    %c0_48 = arith.constant 0 : index
    %c0_49 = arith.constant 0 : index
    %120 = vector.load %arg17[%c0_48, %c0_49] : memref<8x32xf32, #tpu.memory_space<vmem>>, vector<8x32xf32>
    %121 = arith.truncf %120 : vector<8x32xf32> to vector<8x32xbf16>
    %c0_50 = arith.constant 0 : index
    %c0_51 = arith.constant 0 : index
    %122 = vector.load %arg5[%c0_50, %c0_51] : memref<32x32xbf16, #tpu.memory_space<vmem>>, vector<32x32xbf16>
    %cst_52 = arith.constant dense<0.000000e+00> : vector<8x32xf32>
    %123 = tpu.matmul %121, %122, %cst_52 {dimension_numbers = #tpu.dot_dimension_numbers<[1], [0], [0], [1], [0, 0, 1, 1], [], []>} : vector<8x32xbf16>, vector<32x32xbf16>, vector<8x32xf32> -> vector<8x32xf32>
    %c0_53 = arith.constant 0 : index
    %c0_54 = arith.constant 0 : index
    %124 = vector.load %arg6[%c0_53, %c0_54] : memref<1x32xf32, #tpu.memory_space<vmem>>, vector<1x32xf32>
    %125 = vector.broadcast %124 : vector<1x32xf32> to vector<8x32xf32>
    %126 = arith.addf %123, %125 : vector<8x32xf32>
    %127 = arith.addf %1, %126 : vector<8x32xf32>
    %cst_55 = arith.constant dense<0.000000e+00> : vector<8xf32>
    %128 = vector.multi_reduction <add>, %127, %cst_55 [1] : vector<8x32xf32> to vector<8xf32>
    %129 = vector.shape_cast %128 : vector<8xf32> to vector<8x1xf32>
    %cst_56 = arith.constant 3.200000e+01 : f32
    %130 = vector.broadcast %cst_56 : f32 to vector<8x1xf32>
    %131 = arith.divf %129, %130 : vector<8x1xf32>
    %132 = vector.broadcast %131 : vector<8x1xf32> to vector<8x32xf32>
    %133 = arith.subf %127, %132 : vector<8x32xf32>
    %134 = arith.mulf %133, %133 : vector<8x32xf32>
    %cst_57 = arith.constant dense<0.000000e+00> : vector<8xf32>
    %135 = vector.multi_reduction <add>, %134, %cst_57 [1] : vector<8x32xf32> to vector<8xf32>
    %136 = vector.shape_cast %135 : vector<8xf32> to vector<8x1xf32>
    %cst_58 = arith.constant 3.200000e+01 : f32
    %137 = vector.broadcast %cst_58 : f32 to vector<8x1xf32>
    %138 = arith.divf %136, %137 : vector<8x1xf32>
    %139 = vector.broadcast %131 : vector<8x1xf32> to vector<8x32xf32>
    %140 = arith.subf %127, %139 : vector<8x32xf32>
    %cst_59 = arith.constant 9.99999974E-6 : f32
    %141 = vector.broadcast %cst_59 : f32 to vector<8x1xf32>
    %142 = arith.addf %138, %141 : vector<8x1xf32>
    %143 = math.rsqrt %142 : vector<8x1xf32>
    %144 = vector.broadcast %143 : vector<8x1xf32> to vector<8x32xf32>
    %145 = arith.mulf %140, %144 : vector<8x32xf32>
    %c0_60 = arith.constant 0 : index
    %c0_61 = arith.constant 0 : index
    %146 = vector.load %arg7[%c0_60, %c0_61] : memref<1x32xf32, #tpu.memory_space<vmem>>, vector<1x32xf32>
    %147 = vector.broadcast %146 : vector<1x32xf32> to vector<8x32xf32>
    %148 = arith.mulf %145, %147 : vector<8x32xf32>
    %c0_62 = arith.constant 0 : index
    %c0_63 = arith.constant 0 : index
    %149 = vector.load %arg8[%c0_62, %c0_63] : memref<1x32xf32, #tpu.memory_space<vmem>>, vector<1x32xf32>
    %150 = vector.broadcast %149 : vector<1x32xf32> to vector<8x32xf32>
    %151 = arith.addf %148, %150 : vector<8x32xf32>
    %152 = arith.truncf %151 : vector<8x32xf32> to vector<8x32xbf16>
    %c0_64 = arith.constant 0 : index
    %c0_65 = arith.constant 0 : index
    %153 = vector.load %arg9[%c0_64, %c0_65] : memref<32x64xbf16, #tpu.memory_space<vmem>>, vector<32x64xbf16>
    %cst_66 = arith.constant dense<0.000000e+00> : vector<8x64xf32>
    %154 = tpu.matmul %152, %153, %cst_66 {dimension_numbers = #tpu.dot_dimension_numbers<[1], [0], [0], [1], [0, 0, 1, 1], [], []>} : vector<8x32xbf16>, vector<32x64xbf16>, vector<8x64xf32> -> vector<8x64xf32>
    %c0_67 = arith.constant 0 : index
    %c0_68 = arith.constant 0 : index
    %155 = vector.load %arg10[%c0_67, %c0_68] : memref<1x64xf32, #tpu.memory_space<vmem>>, vector<1x64xf32>
    %156 = vector.broadcast %155 : vector<1x64xf32> to vector<8x64xf32>
    %157 = arith.addf %154, %156 : vector<8x64xf32>
    %cst_69 = arith.constant 0.000000e+00 : f32
    %158 = vector.broadcast %cst_69 : f32 to vector<8x64xf32>
    %159 = arith.maximumf %157, %158 : vector<8x64xf32>
    %160 = arith.truncf %159 : vector<8x64xf32> to vector<8x64xbf16>
    %c0_70 = arith.constant 0 : index
    %c0_71 = arith.constant 0 : index
    %161 = vector.load %arg11[%c0_70, %c0_71] : memref<64x32xbf16, #tpu.memory_space<vmem>>, vector<64x32xbf16>
    %cst_72 = arith.constant dense<0.000000e+00> : vector<8x32xf32>
    %162 = tpu.matmul %160, %161, %cst_72 {dimension_numbers = #tpu.dot_dimension_numbers<[1], [0], [0], [1], [0, 0, 1, 1], [], []>} : vector<8x64xbf16>, vector<64x32xbf16>, vector<8x32xf32> -> vector<8x32xf32>
    %c0_73 = arith.constant 0 : index
    %c0_74 = arith.constant 0 : index
    %163 = vector.load %arg12[%c0_73, %c0_74] : memref<1x32xf32, #tpu.memory_space<vmem>>, vector<1x32xf32>
    %164 = vector.broadcast %163 : vector<1x32xf32> to vector<8x32xf32>
    %165 = arith.addf %162, %164 : vector<8x32xf32>
    %166 = arith.addf %151, %165 : vector<8x32xf32>
    %cst_75 = arith.constant dense<0.000000e+00> : vector<8xf32>
    %167 = vector.multi_reduction <add>, %166, %cst_75 [1] : vector<8x32xf32> to vector<8xf32>
    %168 = vector.shape_cast %167 : vector<8xf32> to vector<8x1xf32>
    %cst_76 = arith.constant 3.200000e+01 : f32
    %169 = vector.broadcast %cst_76 : f32 to vector<8x1xf32>
    %170 = arith.divf %168, %169 : vector<8x1xf32>
    %171 = vector.broadcast %170 : vector<8x1xf32> to vector<8x32xf32>
    %172 = arith.subf %166, %171 : vector<8x32xf32>
    %173 = arith.mulf %172, %172 : vector<8x32xf32>
    %cst_77 = arith.constant dense<0.000000e+00> : vector<8xf32>
    %174 = vector.multi_reduction <add>, %173, %cst_77 [1] : vector<8x32xf32> to vector<8xf32>
    %175 = vector.shape_cast %174 : vector<8xf32> to vector<8x1xf32>
    %cst_78 = arith.constant 3.200000e+01 : f32
    %176 = vector.broadcast %cst_78 : f32 to vector<8x1xf32>
    %177 = arith.divf %175, %176 : vector<8x1xf32>
    %178 = vector.broadcast %170 : vector<8x1xf32> to vector<8x32xf32>
    %179 = arith.subf %166, %178 : vector<8x32xf32>
    %cst_79 = arith.constant 9.99999974E-6 : f32
    %180 = vector.broadcast %cst_79 : f32 to vector<8x1xf32>
    %181 = arith.addf %177, %180 : vector<8x1xf32>
    %182 = math.rsqrt %181 : vector<8x1xf32>
    %183 = vector.broadcast %182 : vector<8x1xf32> to vector<8x32xf32>
    %184 = arith.mulf %179, %183 : vector<8x32xf32>
    %c0_80 = arith.constant 0 : index
    %c0_81 = arith.constant 0 : index
    %185 = vector.load %arg13[%c0_80, %c0_81] : memref<1x32xf32, #tpu.memory_space<vmem>>, vector<1x32xf32>
    %186 = vector.broadcast %185 : vector<1x32xf32> to vector<8x32xf32>
    %187 = arith.mulf %184, %186 : vector<8x32xf32>
    %c0_82 = arith.constant 0 : index
    %c0_83 = arith.constant 0 : index
    %188 = vector.load %arg14[%c0_82, %c0_83] : memref<1x32xf32, #tpu.memory_space<vmem>>, vector<1x32xf32>
    %189 = vector.broadcast %188 : vector<1x32xf32> to vector<8x32xf32>
    %190 = arith.addf %187, %189 : vector<8x32xf32>
    %c0_84 = arith.constant 0 : index
    %c0_85 = arith.constant 0 : index
    %c0_86 = arith.constant 0 : index
    %191 = vector.load %arg15[%c0_84, %c0_85, %c0_86] : memref<1x8x32xf32, #tpu.memory_space<vmem>>, vector<1x8x32xf32>
    %192 = vector.shape_cast %191 : vector<1x8x32xf32> to vector<8x32xf32>
    %193 = vector.shape_cast %190 : vector<8x32xf32> to vector<1x8x32xf32>
    tpu.vector_store %arg15[%c0_84, %c0_85, %c0_86], %193 {strides = array<i32>} : memref<1x8x32xf32, #tpu.memory_space<vmem>>, vector<1x8x32xf32>,
    return
  }
  func.func @transform_0(%arg0: i32) -> (i32, i32, i32) {
    %c0_i32 = arith.constant 0 : i32
    %c0_i32_0 = arith.constant 0 : i32
    %c0_i32_1 = arith.constant 0 : i32
    return %arg0, %c0_i32, %c0_i32_0 : i32, i32, i32
  }
  func.func @transform_1(%arg0: i32) -> (i32, i32, i32) {
    %c0_i32 = arith.constant 0 : i32
    %c0_i32_0 = arith.constant 0 : i32
    %c0_i32_1 = arith.constant 0 : i32
    return %arg0, %c0_i32, %c0_i32_0 : i32, i32, i32
  }
  func.func @transform_2(%arg0: i32) -> (i32, i32) {
    %c0_i32 = arith.constant 0 : i32
    %c0_i32_0 = arith.constant 0 : i32
    %c0_i32_1 = arith.constant 0 : i32
    return %c0_i32, %c0_i32_0 : i32, i32
  }
  func.func @transform_3(%arg0: i32) -> (i32, i32) {
    %c0_i32 = arith.constant 0 : i32
    %c0_i32_0 = arith.constant 0 : i32
    %c0_i32_1 = arith.constant 0 : i32
    return %c0_i32, %c0_i32_0 : i32, i32
  }
  func.func @transform_4(%arg0: i32) -> (i32, i32) {
    %c0_i32 = arith.constant 0 : i32
    %c0_i32_0 = arith.constant 0 : i32
    %c0_i32_1 = arith.constant 0 : i32
    return %c0_i32, %c0_i32_0 : i32, i32
  }
  func.func @transform_5(%arg0: i32) -> (i32, i32) {
    %c0_i32 = arith.constant 0 : i32
    %c0_i32_0 = arith.constant 0 : i32
    %c0_i32_1 = arith.constant 0 : i32
    return %c0_i32, %c0_i32_0 : i32, i32
  }
  func.func @transform_6(%arg0: i32) -> (i32, i32) {
    %c0_i32 = arith.constant 0 : i32
    %c0_i32_0 = arith.constant 0 : i32
    %c0_i32_1 = arith.constant 0 : i32
    return %c0_i32, %c0_i32_0 : i32, i32
  }
  func.func @transform_7(%arg0: i32) -> (i32, i32) {
    %c0_i32 = arith.constant 0 : i32
    %c0_i32_0 = arith.constant 0 : i32
    %c0_i32_1 = arith.constant 0 : i32
    return %c0_i32, %c0_i32_0 : i32, i32
  }
  func.func @transform_8(%arg0: i32) -> (i32, i32) {
    %c0_i32 = arith.constant 0 : i32
    %c0_i32_0 = arith.constant 0 : i32
    %c0_i32_1 = arith.constant 0 : i32
    return %c0_i32, %c0_i32_0 : i32, i32
  }
  func.func @transform_9(%arg0: i32) -> (i32, i32) {
    %c0_i32 = arith.constant 0 : i32
    %c0_i32_0 = arith.constant 0 : i32
    %c0_i32_1 = arith.constant 0 : i32
    return %c0_i32, %c0_i32_0 : i32, i32
  }
  func.func @transform_10(%arg0: i32) -> (i32, i32) {
    %c0_i32 = arith.constant 0 : i32
    %c0_i32_0 = arith.constant 0 : i32
    %c0_i32_1 = arith.constant 0 : i32
    return %c0_i32, %c0_i32_0 : i32, i32
  }
  func.func @transform_11(%arg0: i32) -> (i32, i32) {
    %c0_i32 = arith.constant 0 : i32
    %c0_i32_0 = arith.constant 0 : i32
    %c0_i32_1 = arith.constant 0 : i32
    return %c0_i32, %c0_i32_0 : i32, i32
  }
  func.func @transform_12(%arg0: i32) -> (i32, i32) {
    %c0_i32 = arith.constant 0 : i32
    %c0_i32_0 = arith.constant 0 : i32
    %c0_i32_1 = arith.constant 0 : i32
    return %c0_i32, %c0_i32_0 : i32, i32
  }
  func.func @transform_13(%arg0: i32) -> (i32, i32) {
    %c0_i32 = arith.constant 0 : i32
    %c0_i32_0 = arith.constant 0 : i32
    %c0_i32_1 = arith.constant 0 : i32
    return %c0_i32, %c0_i32_0 : i32, i32
  }
  func.func @transform_14(%arg0: i32) -> (i32, i32, i32) {
    %c0_i32 = arith.constant 0 : i32
    %c0_i32_0 = arith.constant 0 : i32
    %c0_i32_1 = arith.constant 0 : i32
    return %arg0, %c0_i32, %c0_i32_0 : i32, i32, i32
  }
  func.func @transform_15(%arg0: i32) -> (i32, i32, i32, i32) {
    %c0_i32 = arith.constant 0 : i32
    %c0_i32_0 = arith.constant 0 : i32
    %c0_i32_1 = arith.constant 0 : i32
    %c0_i32_2 = arith.constant 0 : i32
    return %arg0, %c0_i32, %c0_i32_0, %c0_i32_1 : i32, i32, i32, i32
  }
}

</mosaic_0001>

<bundles_post_ra>
// kernel: tpu_custom_call.1
= control target key start
LH: loop header
LB: loop body
LE: loop exit
PB: predicated region body
PF: predicated region fallthrough
CT: control target
= control target key end

     0   :  { %s2345_s0 = inlined_call_operand.vmem [shape: f32[2,8,32], index: 0, kind: input, shape index: {}]   ;;  %s2346_s1 = inlined_call_operand.vmem [shape: f32[2,1,8], index: 1, kind: input, shape index: {}]   ;;  %s2347_s2 = inlined_call_operand.vmem [shape: bf16[32,96], index: 2, kind: input, shape index: {}]   ;;  %s2348_s3 = inlined_call_operand.vmem [shape: f32[1,96], index: 3, kind: input, shape index: {}]   ;;  %s2349_s4 = inlined_call_operand.vmem [shape: bf16[32,32], index: 4, kind: input, shape index: {}]   ;;  %s2350_s5 = inlined_call_operand.vmem [shape: f32[1,32], index: 5, kind: input, shape index: {}]   ;;  %s2351_s6 = inlined_call_operand.vmem [shape: f32[1,32], index: 6, kind: input, shape index: {}]   ;;  %s2352_s7 = inlined_call_operand.vmem [shape: f32[1,32], index: 7, kind: input, shape index: {}]   ;;  %s2353_s8 = inlined_call_operand.hbm [shape: bf16[32,64], index: 8, kind: input, shape index: {}]   ;;  %s2354_s9 = inlined_call_operand.vmem [shape: f32[1,64], index: 9, kind: input, shape index: {}]   ;;  %s2355_s10 = inlined_call_operand.vmem [shape: bf16[64,32], index: 10, kind: input, shape index: {}]   ;;  %s2356_s11 = inlined_call_operand.vmem [shape: f32[1,32], index: 11, kind: input, shape index: {}]   ;;  %s2357_s12 = inlined_call_operand.vmem [shape: f32[1,32], index: 12, kind: input, shape index: {}]   ;;  %s2358_s13 = inlined_call_operand.vmem [shape: f32[1,32], index: 13, kind: input, shape index: {}]   ;;  %s2359_s14 = inlined_call_operand.hbm [shape: f32[2,8,32], index: 14, kind: output, shape index: {0}]   ;;  %s2360_s15 = inlined_call_operand.hbm [shape: f32[2,4,8,8], index: 15, kind: output, shape index: {1}]  }
   0x1   :  { %2370 = sst [smem:[#allocation17_spill]] %s2345_s0 }
   0x2   :  { %2371 = sst [smem:[#allocation18_spill]] %s2346_s1 }
   0x3   :  { %21 = vsyncpa [#allocation4], 0 }
   0x4   :  { %22 = vsyncpa [#allocation5], 0 }
   0x5   :  { %24 = vsyncpa [#allocation5 + $0x1], 0 }
   0x6   :  { %25 = vsyncpa [#allocation8], 0 }
   0x7   :  { %27 = vsyncpa [#allocation8 + $0x1], 0  ;;  %s2011_s18 = smov 0   ;;  %s2013_s19 = smov 0  }
   0x8   :  { %s2015_s20 = smov 0   ;;  %s2017_s21 = smov 0  }
   0x9 LB: > { %2372 = sst [smem:[#allocation12_spill]] %s1895_s18  ;;  %s2032_s22 = sadd.s32 4294967295, %s1907_s21   ;;  %s1907_s21 = sphi %s2017_s21, %s2392_s21   ;;  %s1903_s20 = sphi %s2015_s20, %s2394_s20   ;;  %s1899_s19 = sphi %s2013_s19, %s2396_s19   ;;  %s1895_s18 = sphi %s2011_s18, %s2395_s18  }
   0xa   : > { %2373 = sst [smem:[#allocation13_spill]] %s1903_s20  ;;  %s1513_s23 = sadd.s32 4294967294, %s1907_s21  }
   0xb   : > { %s2036_s24 = sadd.s32 1, %s1907_s21   ;;  %s344_s25 = sadd.s32 1, %s1903_s20 }
   0xc   : > { %2374 = sst [smem:[#allocation14_spill]] %s2036_s24  ;;  %s341_s26 = ssub.s32 %s1907_s21, %s2036_s24 }
   0xd   : > { %p354_p0 = scmp.ne.s32.totalorder %s1903_s20, %s1899_s19  ;;  %p342_p1 = scmp.eq.s32.totalorder %s341_s26, 0 }
   0xe   : > { %p355_p2 = scmp.eq.s32.totalorder %s2032_s22, 1  ;;  %p360_p3 = scmp.ne.s32.totalorder %s1899_s19, %s1895_s18 }
   0xf   : > { %p361_p4 = scmp.eq.s32.totalorder %s1513_s23, 1  ;;  %p1514_p7 = scmp.ge.s32.totalorder %s1907_s21, 1 }
  0x10   : > { %s2047_s27 = scalar_select %p342_p1, %s1903_s20, %s344_s25  }
  0x11   : > { %p2049_p5 = por %p355_p2, %p354_p0  ;;  %p2053_p6 = por %p361_p4, %p360_p3 }
  0x12   : > { %2375 = sst [smem:[#allocation15_spill]] %s2047_s27  ;;  %p394_p8 = scmp.lt.s32.totalorder %s1907_s21, 3 }
  0x13   : > { %s2376_s28 = scalar_select %p2049_p5, 1, 0 }
  0x14   : > { %s2377_s29 = scalar_select %p2053_p6, 1, 0 }
  0x15   : > { %p2366_p9 = scmp.eq.s32.totalorder %s2032_s22, 0  ;;  %p2060_p10 = pnand %p1514_p7, %p394_p8 }
  0x16   : > { %2378 = sst [smem:[#allocation16_spill]] %s2377_s29  ;;  %s1909_s16 = smov [#allocation3]  }
  0x17   : > { %s2379_s30 = scalar_select %p2060_p10, 1, 0 }
  0x18   : > { %s424_s17 = sshll.u32 %s1909_s16, 4  ;;  %p1685_p11 = pneg %p2060_p10  ;;  %s425_s17 = int_to_ptr.vmem [resolvable:$true] %s424_s17 }
  0x19   : > { %s1781_s27 = scalar_lea.hbm %s2353_s8, 256 }
  0x1a   : > { %p2068_p12 = pnand %p2366_p9, %p1685_p11  ;;  %p1782_p13 = scmp.ne.s32.totalorder %s2353_s8, %s1781_s27 }
  0x1b   : > { %p1788_p3 = scmp.lt.u32.totalorder %s1781_s27, %s2353_s8 }
  0x1c   : > { %p1783_p0 = pneg %p2068_p12 }
  0x1e   : > { %p1784_p1 = pnand %p1783_p0, %p1782_p13 }
  0x20   : > { %p1785_p2 = pneg %p1784_p1 }
  0x22   : > { %p1790_p4 = pnand %p1788_p3, %p1785_p2 }
  0x24   : > { %1793 = shalt.err (!%p1790_p4)
}
  0x25   : > { %s1794_s18 = scalar_lea.vmem %s425_s17, 256  ;;  %p1802_p9 = scmp.lt.s32.totalorder %s425_s17, %s425_s17 }
  0x26   : > { %p1795_p7 = scmp.ne.s32.totalorder %s425_s17, %s1794_s18  ;;  %p1803_p6 = scmp.lt.s32.totalorder %s1794_s18, %s1794_s18 }
  0x28   : > { %p1797_p8 = pnand %p1795_p7, %p1783_p0  ;;  %p1804_p5 = por %p1803_p6, %p1802_p9 }
  0x2a   : > { %p1798_p11 = pneg %p1797_p8 }
  0x2c   : > { %p1805_p10 = pnand %p1804_p5, %p1798_p11 }
  0x2e   : > { %1808 = shalt.err (!%p1805_p10)
}
  0x2f   : > { %s1910_s20 = smov 64   ;;  %s1911_s24 = smov 4  }
  0x30   : > { %1688 = dma.hbm_to_vmem [thread:$0]  (!%p2068_p12), %s2353_s8, 256, %s425_s17, [#allocation4], %s1910_s20, %s1910_s20, %s1911_s24  }
  0x31   : > { %p2381_p13 = scmp.ne.s32.totalorder %s2379_s30, 0 }
  0x32   : > { %p2382_p1 = scmp.eq.s32.totalorder (!%p2381_p13), %s2032_s22, 0 }
  0x33   : > { %468 = sbr.rel (%p2381_p13) target bundleno = 2631 (0xa47), region = 76 }
  0x3a   : > { %1882 = dma.done.wait (%p2382_p1), [#allocation4], 256   ;;  %p2383_p0 = pmov %p2382_p1 }
  0x3b   : > { %p523_p5 = scmp.lt.s32.totalorder %s2032_s22, 1  ;;  %v1912_v0 = vmov 0.0   ;;  %vm1913_vm0 = vmmov 0   ;;  %s2384_s0 = sld [smem:[#allocation17_spill]]  ;;  %v1751_v1 = vld [vmem:[%s2347_s2] sm:$0xff]   ;;  %v1752_v2 = vld [vmem:[%s2347_s2 + $0x8] sm:$0xff]   ;;  %v655_v23 = vlaneseq }
  0x3c   : > { %1884 = vsyncadd (%p2383_p0), [#allocation4], 4294967040  ;;  %1593 = vmatprep.subr.bf16.mxu0 %v1912_v0  ;;  %1597 = vmatprep.mubr.msk.bf16.mxu0 %vm1913_vm0, %v1912_v0  ;;  %vm556_vm1 = vcmask 261120   ;;  %v1522_v5 = vld [vmem:[%s2348_s3] ss:$0 sm:$0xff]  ;;  %s1915_s29 = smov 96  }
  0x3d   : > { %s2099_s18 = scalar_select %p523_p5, %s2032_s22, 1  ;;  %1601 = vmatprep.subr.bf16.mxu1 %v1912_v0  ;;  %1603 = vmatprep.mubr.msk.bf16.mxu1 %vm1913_vm0, %v1912_v0  ;;  %vm606_vm2 = vcmask 64512   ;;  %v656_v24 = vshrl.u32 %v655_v23, 7  ;;  %vm679_vm3 = vcmask 1043456   ;;  %vm842_vm4 = vcmask 130112  }
  0x3e   : > { %1594 = vmatpush3.bf16.msra.mxu0 %v1751_v1  ;;  %s1916_s30 = smov 80   ;;  %s1918_s23 = smov 72   ;;  %vm962_vm5 = vcmask 195712   ;;  %vm1082_vm6 = vcmask 261312   ;;  %vm1291_vm7 = vcmask 523264  }
  0x3f   : > { %s1521_s27 = sshll.u32 %s2099_s18, 3  ;;  %1595 = vmatprep.subr.bf16.mxu0 %v1912_v0  ;;  %s1919_s16 = smov 112   ;;  %v657_v27 = vsub.s32 0, %v656_v24 }
  0x40   : > { %s1920_s20 = smov 104   ;;  %s2385_s1 = sld [smem:[#allocation18_spill]] }
  0x41   : > { %s526_s17 = scalar_lea.vmem %s2384_s0, %s1521_s27  ;;  %s1914_s27 = smov 120  }
  0x42   : > { %v2114_v3 = vld [vmem:[%s526_s17] sm:$0xff]  ;;  %1596 = vmatpush3.bf16.msra.mxu0 %v1752_v2  ;;  %s1917_s17 = smov 88   ;;  %s1562_s25 = sshll.u32 %s2032_s22, 9 }
  0x43   : > { %v532_v4 = vpack.c.bf16 %v2114_v3, %v2114_v3  ;;  %1607 = vmatprep.subr.bf16.mxu0 %v1912_v0  ;;  %p2386_p9 = scmp.ne.s32.totalorder %s2376_s28, 0 }
  0x45   : > { %1598 = vmatmul.mubr.msk.bf16.vlgmr.msra.gmra.mrb[0].mxu0 %vm556_vm1, %v532_v4 }
  0x46   : > { %1609 = vmatprep.mubr.msk.bf16.mxu0 %vm1913_vm0, %v1912_v0  ;;  %s529_s26 = scalar_lea.vmem %s2385_s1, %s2099_s18  ;;  %s1921_s18 = smov 56  }
  0x47   : > { %v600_v25 = vld [vmem:[%s529_s26] sm:$0x1] }
  0x48   : > { %v601_v26 = vmul.f32 -1e+09, %v600_v25 }
  0x4a   : > { %v658_v28 = vrot.slane %v601_v26, %v657_v27 }
 0x118   : > { %v594_v6 = vpop.f32.mrb[0].mxu0 }
 0x119   : > { %v595_v7 = vadd.f32 %v1522_v5, %v594_v6  ;;  %v1599_v8 = vpop.f32.mrb[1].mxu0 }
 0x11a   : > { %v597_v9 = vpop.f32.mrb[2].mxu0 }
 0x11b   : > { %v2126_v10 = vpack.c.bf16 %v595_v7, %v595_v7  ;;  %v1600_v11 = vpop.f32.mrb[3].mxu0 }
 0x11d   : > { %724 = vrot.lane.b32.xlu1 %v2126_v10, %s1914_s27  ;;  %604 = vrot.lane.b32.xlu0 %v2126_v10, %s1915_s29  ;;  %s1922_s27 = smov 64   ;;  %s1923_s29 = smov 40  }
 0x121   : > { %846 = vrot.lane.b32.xlu1 %v2126_v10, %s1916_s30  ;;  %726 = vrot.lane.b32.xlu0 %v2126_v10, %s1917_s17  ;;  %s1924_s30 = smov 48   ;;  %s2173_s17 = sand.u32 1, %s1899_s19  }
 0x125   : > { %966 = vrot.lane.b32.xlu1 %v2126_v10, %s1918_s23  ;;  %844 = vrot.lane.b32.xlu0 %v2126_v10, %s1919_s16  ;;  %s1520_s23 = sshll.u32 %s2173_s17, 5 }
 0x126   : > { %s2176_s16 = scalar_lea.vmem [#allocation7], %s1520_s23  ;;  %s1928_s23 = smov [#allocation7]  }
 0x127   : > { %s1398_s24 = sshll.u32 %s2176_s16, 4  ;;  %s2258_s24 = int_to_ptr.vmem [resolvable:$true] %s1398_s24 }
 0x129   : > { %964 = vrot.lane.b32.xlu0 %v2126_v10, %s1920_s20  ;;  %s2369_s20 = smov 8  }
 0x18f   : > { %v605_v12 = vpop.permute.xlu0 %604  ;;  %v725_v15 = vpop.permute.xlu1 %724 }
 0x190   : > { %v611_v13 = vsel %vm606_vm2, %v605_v12, 0 }
 0x191   : > { %1602 = vmatpush3.bf16.xpose.msra.mxu1 %v611_v13 }
 0x192   : > { %1613 = vmatprep.subr.bf16.mxu1 %v1912_v0 }
 0x193   : > { %v727_v14 = vpop.permute.xlu0 %726  ;;  %v847_v17 = vpop.permute.xlu1 %846 }
 0x194   : > { %v732_v16 = vsel %vm606_vm2, %v727_v14, 0  ;;  %v852_v18 = vsel %vm606_vm2, %v847_v17, 0 }
 0x197   : > { %v967_v19 = vpop.permute.xlu1 %966  ;;  %v845_v20 = vpop.permute.xlu0 %844 }
 0x198   : > { %1604 = vmatmul.mubr.msk.bf16.vlgmr.msra.gmra.mrb[0].mxu1 %vm606_vm2, %v2126_v10  ;;  %v972_v21 = vsel %vm606_vm2, %v967_v19, 0 }
 0x199   : > { %1614 = vmatpush3.bf16.xpose.msra.mxu1 %v732_v16  ;;  %1615 = vmatprep.mubr.msk.bf16.mxu1 %vm1913_vm0, %v1912_v0 }
 0x19a   : > { %1625 = vmatprep.subr.bf16.mxu1 %v1912_v0 }
 0x19b   : > { %v965_v22 = vpop.permute.xlu0 %964 }
 0x1a0   : > { %1616 = vmatmul.mubr.msk.bf16.vlgmr.msra.gmra.mrb[4].mxu1 %vm606_vm2, %v725_v15 }
 0x1a1   : > { %1626 = vmatpush3.bf16.xpose.msra.mxu1 %v852_v18  ;;  %1627 = vmatprep.mubr.msk.bf16.mxu1 %vm1913_vm0, %v1912_v0 }
 0x1a2   : > { %1637 = vmatprep.subr.bf16.mxu1 %v1912_v0 }
 0x1a8   : > { %1628 = vmatmul.mubr.msk.bf16.vlgmr.msra.gmra.mrb[8].mxu1 %vm606_vm2, %v845_v20 }
 0x1a9   : > { %1638 = vmatpush3.bf16.xpose.msra.mxu1 %v972_v21  ;;  %1639 = vmatprep.mubr.msk.bf16.mxu1 %vm1913_vm0, %v1912_v0 }
 0x1aa   : > { %1649 = vmatprep.subr.bf16.mxu1 %v1912_v0 }
 0x1b0   : > { %1640 = vmatmul.mubr.msk.bf16.vlgmr.msra.gmra.mrb[12].mxu1 %vm606_vm2, %v965_v22 }
 0x1b1   : > { %1653 = vmatprep.mubr.msk.bf16.mxu1 %vm1913_vm0, %v1912_v0 }
 0x26b   : > { %v647_v29 = vpop.f32.mrb[0].mxu1 }
 0x26c   : > { %v653_v30 = vmul.f32 0.35355338, %v647_v29  ;;  %v1605_v31 = vpop.f32.mrb[1].mxu1 }
 0x26d   : > { %v650_v32 = vpop.f32.mrb[2].mxu1 }
 0x26e   : > { %v1606_v33 = vpop.f32.mrb[3].mxu1  ;;  %v660_v34 = vadd.f32 %v658_v28, %v653_v30 }
 0x270   : > { %v661_v35 = vsel %vm606_vm2, %v660_v34, -inf }
 0x271   : > { %662 = vmax.xlane.f32.xlu1 %v661_v35 }
 0x273   : > { %v768_v36 = vpop.f32.mrb[4].mxu1 }
 0x274   : > { %v774_v37 = vmul.f32 0.35355338, %v768_v36  ;;  %v1617_v38 = vpop.f32.mrb[5].mxu1 }
 0x275   : > { %v771_v39 = vpop.f32.mrb[6].mxu1 }
 0x276   : > { %v1618_v40 = vpop.f32.mrb[7].mxu1  ;;  %v775_v41 = vadd.f32 %v774_v37, %v658_v28 }
 0x278   : > { %v776_v42 = vsel %vm606_vm2, %v775_v41, -inf }
 0x279   : > { %777 = vmax.xlane.f32.xlu0 %v776_v42 }
 0x27b   : > { %v888_v43 = vpop.f32.mrb[8].mxu1 }
 0x27c   : > { %v894_v44 = vmul.f32 0.35355338, %v888_v43  ;;  %v1629_v45 = vpop.f32.mrb[9].mxu1 }
 0x27d   : > { %v891_v46 = vpop.f32.mrb[10].mxu1 }
 0x27e   : > { %v1630_v47 = vpop.f32.mrb[11].mxu1  ;;  %v895_v48 = vadd.f32 %v894_v44, %v658_v28 }
 0x27f   : > { %v1753_v47 = vld [vmem:[%s2349_s4] sm:$0xff]  }
 0x280   : > { %v896_v49 = vsel %vm606_vm2, %v895_v48, -inf  ;;  %1650 = vmatpush3.bf16.msra.mxu1 %v1753_v47 }
 0x281   : > { %897 = vmax.xlane.f32.xlu0 %v896_v49  ;;  %1651 = vmatprep.subr.bf16.mxu1 %v1912_v0 }
 0x283   : > { %v1008_v50 = vpop.f32.mrb[12].mxu1 }
 0x284   : > { %v1014_v51 = vmul.f32 0.35355338, %v1008_v50  ;;  %v1641_v52 = vpop.f32.mrb[13].mxu1 }
 0x285   : > { %v1011_v53 = vpop.f32.mrb[14].mxu1 }
 0x286   : > { %v1642_v54 = vpop.f32.mrb[15].mxu1  ;;  %v1015_v55 = vadd.f32 %v1014_v51, %v658_v28 }
 0x288   : > { %v1016_v56 = vsel %vm606_vm2, %v1015_v55, -inf }
 0x289   : > { %1017 = vmax.xlane.f32.xlu1 %v1016_v56 }
 0x2fe   : > { %v663_v57 = vpop.xlane.xlu1 %662 }
 0x2ff   : > { %v664_v58 = vsub.f32 %v660_v34, %v663_v57 }
 0x301   : > { %v665_v59 = vmul.f32 1.442695, %v664_v58 }
 0x303   : > { %1761 = vpow2.f32 %v665_v59 }
 0x306   : > { %v778_v60 = vpop.xlane.xlu0 %777 }
 0x307   : > { %v779_v61 = vsub.f32 %v775_v41, %v778_v60 }
 0x309   : > { %v780_v62 = vmul.f32 1.442695, %v779_v61 }
 0x30b   : > { %1763 = vpow2.f32 %v780_v62  ;;  %v1537_v62 = vld [vmem:[%s2350_s5] ss:$0 sm:$0xff] }
 0x30d   : > { %v1762_v63 = vpop.eup %1761 }
 0x30e   : > { %v898_v1 = vpop.xlane.xlu0 %897  ;;  %v667_v2 = vsel %vm606_vm2, %v1762_v63, 0.0 }
 0x30f   : > { %v899_v4 = vsub.f32 %v895_v48, %v898_v1  ;;  %668 = vadd.xlane.f32.xlu0 %v667_v2  ;;  %v1754_v48 = vld [vmem:[%s2349_s4 + $0x8] sm:$0xff]  }
 0x310   : > { %1652 = vmatpush3.bf16.msra.mxu1 %v1754_v48 }
 0x311   : > { %v900_v5 = vmul.f32 1.442695, %v899_v4  ;;  %1665 = vmatprep.subr.bf16.mxu1 %v1912_v0 }
 0x313   : > { %1765 = vpow2.f32 %v900_v5 }
 0x315   : > { %v1764_v6 = vpop.eup %1763 }
 0x316   : > { %v782_v7 = vsel %vm606_vm2, %v1764_v6, 0.0  ;;  %v1018_v11 = vpop.xlane.xlu1 %1017 }
 0x317   : > { %783 = vadd.xlane.f32.xlu1 %v782_v7  ;;  %v1019_v12 = vsub.f32 %v1015_v55, %v1018_v11 }
 0x319   : > { %v1020_v13 = vmul.f32 1.442695, %v1019_v12 }
 0x31b   : > { %1767 = vpow2.f32 %v1020_v13 }
 0x31d   : > { %v1766_v8 = vpop.eup %1765 }
 0x31e   : > { %v902_v9 = vsel %vm606_vm2, %v1766_v8, 0.0 }
 0x31f   : > { %903 = vadd.xlane.f32.xlu0 %v902_v9 }
 0x325   : > { %v1768_v14 = vpop.eup %1767 }
 0x326   : > { %v1022_v15 = vsel %vm606_vm2, %v1768_v14, 0.0 }
 0x328   : > { %790 = vrot.lane.b32.xlu1 %v2126_v10, %s1921_s18 }
 0x335   : > { %674 = vrot.lane.b32.xlu0 %v2126_v10, %s1922_s27  ;;  %s1926_s27 = smov 16  }
 0x339   : > { %1030 = vrot.lane.b32.xlu0 %v2126_v10, %s1923_s29  ;;  %s1927_s29 = smov 24  }
 0x34c   : > { %1023 = vadd.xlane.f32.xlu1 %v1022_v15  ;;  %v1756_v15 = vld [vmem:[#allocation3 + $0x8] sm:$0xff]  }
 0x35d   : > { %910 = vrot.lane.b32.xlu1 %v2126_v10, %s1924_s30  ;;  %s1809_s30 = scalar_lea.vmem %s2258_s24, 512 }
 0x35e   : > { %p1810_p6 = scmp.ne.s32.totalorder %s2258_s24, %s1809_s30 }
 0x360   : > { %p1811_p10 = pnand %p1810_p6, %p2386_p9 }
 0x362   : > { %p1812_p12 = pneg %p1811_p10 }
 0x39c   : > { %v669_v16 = vpop.xlane.xlu0 %668 }
 0x39d   : > { %1769 = vrcp.f32 %v669_v16  ;;  %v1758_v16 = vld [vmem:[%s2355_s10 + $0x8] sm:$0xff]  }
 0x3a4   : > { %v784_v17 = vpop.xlane.xlu1 %783 }
 0x3a5   : > { %1771 = vrcp.f32 %v784_v17 }
 0x3a7   : > { %v1770_v18 = vpop.eup %1769 }
 0x3a8   : > { %v671_v19 = vmul.f32 %v1770_v18, %v1762_v63  ;;  %v791_v24 = vpop.permute.xlu1 %790 }
 0x3a9   : > { %v796_v26 = vsel %vm679_vm3, %v791_v24, 0 }
 0x3aa   : > { %672 = vst.msk [vmem:[%s2176_s16] sm:$0xff] %vm606_vm2, %v671_v19  ;;  %v673_v25 = vpack.c.bf16 %v671_v19, %v671_v19 }
 0x3ac   : > { %v904_v20 = vpop.xlane.xlu0 %903 }
 0x3ad   : > { %1773 = vrcp.f32 %v904_v20 }
 0x3af   : > { %v1772_v21 = vpop.eup %1771 }
 0x3b0   : > { %v786_v10 = vmul.f32 %v1772_v21, %v1764_v6  ;;  %v675_v22 = vpop.permute.xlu0 %674  ;;  %v1541_v21 = vld [vmem:[%s2351_s6] ss:$0 sm:$0xff] }
 0x3b1   : > { %v681_v23 = vsel %vm679_vm3, %v675_v22, 0  ;;  %v1542_v22 = vld [vmem:[%s2352_s7] ss:$0 sm:$0xff] }
 0x3b2   : > { %1608 = vmatpush3.bf16.msra.mxu0 %v681_v23  ;;  %1529 = vst.msk [vmem:[%s2176_s16 + $0x8] sm:$0xff] %vm606_vm2, %v786_v10  ;;  %v789_v29 = vpack.c.bf16 %v786_v10, %v786_v10 }
 0x3b3   : > { %1619 = vmatprep.subr.bf16.mxu0 %v1912_v0 }
 0x3b4   : > { %v1031_v33 = vpop.permute.xlu0 %1030 }
 0x3b5   : > { %1610 = vmatmul.mubr.msk.bf16.vlgmr.msra.gmra.mrb[4].mxu0 %vm606_vm2, %v673_v25  ;;  %v1036_v35 = vsel %vm679_vm3, %v1031_v33, 0 }
 0x3b6   : > { %1620 = vmatpush3.bf16.msra.mxu0 %v796_v26  ;;  %1621 = vmatprep.mubr.msk.bf16.mxu0 %vm1913_vm0, %v1912_v0  ;;  %v1759_v26 = vld [vmem:[%s2355_s10 + $0x10] sm:$0xff]  }
 0x3b7   : > { %v1774_v27 = vpop.eup %1773  ;;  %1631 = vmatprep.subr.bf16.mxu0 %v1912_v0 }
 0x3b8   : > { %v906_v28 = vmul.f32 %v1774_v27, %v1766_v8  ;;  %v1760_v27 = vld [vmem:[%s2355_s10 + $0x18] sm:$0xff]  }
 0x3ba   : > { %1532 = vst.msk [vmem:[%s2176_s16 + $0x10] sm:$0xff] %vm606_vm2, %v906_v28  ;;  %v909_v34 = vpack.c.bf16 %v906_v28, %v906_v28  ;;  %v1543_v28 = vld [vmem:[%s2354_s9] ss:$0 sm:$0xff] }
 0x3bd   : > { %1622 = vmatmul.mubr.msk.bf16.vlgmr.msra.gmra.mrb[8].mxu0 %vm606_vm2, %v789_v29 }
 0x3be   : > { %1633 = vmatprep.mubr.msk.bf16.mxu0 %vm1913_vm0, %v1912_v0 }
 0x3d9   : > { %v1024_v30 = vpop.xlane.xlu1 %1023 }
 0x3da   : > { %1775 = vrcp.f32 %v1024_v30 }
 0x3dd   : > { %v911_v31 = vpop.permute.xlu1 %910 }
 0x3de   : > { %v916_v32 = vsel %vm679_vm3, %v911_v31, 0 }
 0x3df   : > { %1632 = vmatpush3.bf16.msra.mxu0 %v916_v32 }
 0x3e0   : > { %1643 = vmatprep.subr.bf16.mxu0 %v1912_v0 }
 0x3e2   : > { %1634 = vmatmul.mubr.msk.bf16.vlgmr.msra.gmra.mrb[12].mxu0 %vm606_vm2, %v909_v34 }
 0x3e3   : > { %1644 = vmatpush3.bf16.msra.mxu0 %v1036_v35  ;;  %1645 = vmatprep.mubr.msk.bf16.mxu0 %vm1913_vm0, %v1912_v0 }
 0x3e4   : > { %v1776_v36 = vpop.eup %1775  ;;  %1657 = vmatprep.subr.bf16.mxu0 %v1912_v0 }
 0x3e5   : > { %v1026_v37 = vmul.f32 %v1776_v36, %v1768_v14  ;;  %v1755_v14 = vld [vmem:[#allocation3] sm:$0xff]  }
 0x3e7   : > { %v1029_v38 = vpack.c.bf16 %v1026_v37, %v1026_v37  ;;  %1535 = vst.msk [vmem:[%s2176_s16 + $0x18] sm:$0xff] %vm606_vm2, %v1026_v37 }
 0x3ea   : > { %1646 = vmatmul.mubr.msk.bf16.vlgmr.msra.gmra.mrb[16].mxu0 %vm606_vm2, %v1029_v38 }
 0x3eb   : > { %1661 = vmatprep.mubr.msk.bf16.mxu0 %vm1913_vm0, %v1912_v0  ;;  %1658 = vmatpush3.bf16.msra.mxu0 %v1755_v14 }
 0x3ec   : > { %1659 = vmatprep.subr.bf16.mxu0 %v1912_v0 }
 0x3ef   : > { %1660 = vmatpush3.bf16.msra.mxu0 %v1756_v15 }
 0x488   : > { %v717_v39 = vpop.f32.mrb[4].mxu0 }
 0x489   : > { %723 = vst.msk [vmem:[#allocation2] sm:$0xff] %vm606_vm2, %v717_v39  ;;  %v1611_v40 = vpop.f32.mrb[5].mxu0 }
 0x48a   : > { %v720_v41 = vpop.f32.mrb[6].mxu0 }
 0x48b   : > { %v1612_v42 = vpop.f32.mrb[7].mxu0 }
 0x490   : > { %v832_v43 = vpop.f32.mrb[8].mxu0 }
 0x491   : > { %839 = vrot.lane.b32.xlu1 %v832_v43, %s2369_s20  ;;  %v1623_v44 = vpop.f32.mrb[9].mxu0  ;;  %s1813_s20 = sshll.u32 %s1928_s23, 4  ;;  %s1814_s20 = int_to_ptr.vmem [resolvable:$false] %s1813_s20 }
 0x492   : > { %v835_v45 = vpop.f32.mrb[10].mxu0  ;;  %s1815_s16 = scalar_lea.vmem %s1814_s20, 1024  ;;  %p1816_p2 = scmp.lt.s32.totalorder %s2258_s24, %s1814_s20 }
 0x493   : > { %v1624_v46 = vpop.f32.mrb[11].mxu0  ;;  %p1817_p3 = scmp.lt.s32.totalorder %s1815_s16, %s1809_s30 }
 0x495   : > { %p1818_p4 = por %p1817_p3, %p1816_p2 }
 0x497   : > { %p1819_p7 = pnand %p1818_p4, %p1812_p12 }
 0x4b5   : > { %v952_v49 = vpop.f32.mrb[12].mxu0 }
 0x4b6   : > { %959 = vrot.lane.b32.xlu0 %v952_v49, %s1926_s27  ;;  %v1635_v50 = vpop.f32.mrb[13].mxu0  ;;  %s2263_s27 = scalar_lea.hbm %s2360_s15, %s1562_s25 }
 0x4b7   : > { %v955_v51 = vpop.f32.mrb[14].mxu0 }
 0x4b8   : > { %v1636_v52 = vpop.f32.mrb[15].mxu0 }
 0x4bd   : > { %v1072_v53 = vpop.f32.mrb[16].mxu0 }
 0x4be   : > { %1079 = vrot.lane.b32.xlu1 %v1072_v53, %s1927_s29  ;;  %v1647_v54 = vpop.f32.mrb[17].mxu0 }
 0x4bf   : > { %v1075_v55 = vpop.f32.mrb[18].mxu0 }
 0x4c0   : > { %v1648_v56 = vpop.f32.mrb[19].mxu0 }
 0x503   : > { %v840_v57 = vpop.permute.xlu1 %839 }
 0x504   : > { %843 = vst.msk [vmem:[#allocation2] sm:$0xff] %vm842_vm4, %v840_v57 }
 0x528   : > { %v960_v58 = vpop.permute.xlu0 %959 }
 0x529   : > { %963 = vst.msk [vmem:[#allocation2] sm:$0xff] %vm962_vm5, %v960_v58 }
 0x530   : > { %v1080_v59 = vpop.permute.xlu1 %1079 }
 0x531   : > { %1083 = vst.msk [vmem:[#allocation2] sm:$0xff] %vm1082_vm6, %v1080_v59 }
 0x538   : > { %v1084_v60 = vld [vmem:[#allocation2] sm:$0xff] }
 0x539   : > { %v1085_v61 = vpack.c.bf16 %v1084_v60, %v1084_v60 }
 0x53b   : > { %1654 = vmatmul.mubr.msk.bf16.vlgmr.msra.gmra.mrb[16].mxu1 %vm556_vm1, %v1085_v61 }
 0x53c   : > { %1673 = vmatprep.mubr.msk.bf16.mxu1 %vm1913_vm0, %v1912_v0 }
 0x60e   : > { %v1146_v63 = vpop.f32.mrb[16].mxu1 }
 0x60f   : > { %v1147_v1 = vadd.f32 %v1537_v62, %v1146_v63  ;;  %v1655_v2 = vpop.f32.mrb[17].mxu1 }
 0x610   : > { %v1149_v4 = vpop.f32.mrb[18].mxu1 }
 0x611   : > { %v1656_v5 = vpop.f32.mrb[19].mxu1  ;;  %v1152_v6 = vadd.f32 %v1147_v1, %v2114_v3  ;;  %v1757_v3 = vld [vmem:[%s2355_s10] sm:$0xff]  }
 0x612   : > { %1666 = vmatpush3.bf16.msra.mxu1 %v1757_v3 }
 0x613   : > { %v1153_v7 = vsel %vm556_vm1, %v1152_v6, 0.0  ;;  %1667 = vmatprep.subr.bf16.mxu1 %v1912_v0 }
 0x614   : > { %1154 = vadd.xlane.f32.xlu0 %v1153_v7 }
 0x616   : > { %1668 = vmatpush3.bf16.msra.mxu1 %v1758_v16 }
 0x617   : > { %1669 = vmatprep.subr.bf16.mxu1 %v1912_v0 }
 0x61a   : > { %1670 = vmatpush3.bf16.msra.mxu1 %v1759_v26 }
 0x61b   : > { %1671 = vmatprep.subr.bf16.mxu1 %v1912_v0  ;;  %v1547_v0 = vld [vmem:[%s2356_s11] ss:$0 sm:$0xff] }
 0x61e   : > { %1672 = vmatpush3.bf16.msra.mxu1 %v1760_v27 }
 0x6a1   : > { %v1155_v8 = vpop.xlane.xlu0 %1154 }
 0x6a2   : > { %v1157_v9 = vmul.f32 0.03125, %v1155_v8 }
 0x6a4   : > { %v1158_v11 = vsub.f32 %v1152_v6, %v1157_v9 }
 0x6a6   : > { %v1159_v12 = vmul.f32 %v1158_v11, %v1158_v11 }
 0x6a8   : > { %v1160_v13 = vsel %vm556_vm1, %v1159_v12, 0.0 }
 0x6a9   : > { %1161 = vadd.xlane.f32.xlu1 %v1160_v13 }
 0x736   : > { %v1162_v17 = vpop.xlane.xlu1 %1161 }
 0x737   : > { %v1163_v18 = vmul.f32 0.03125, %v1162_v17 }
 0x739   : > { %v1164_v19 = vadd.f32 1e-05, %v1163_v18 }
 0x73b   : > { %1777 = vrsqrt.f32 %v1164_v19 }
 0x745   : > { %v1778_v20 = vpop.eup %1777 }
 0x746   : > { %v1166_v10 = vmul.f32 %v1778_v20, %v1158_v11 }
 0x748   : > { %v1174_v23 = vmul.f32 %v1541_v21, %v1166_v10 }
 0x74a   : > { %v1182_v24 = vadd.f32 %v1542_v22, %v1174_v23 }
 0x74c   : > { %v1183_v25 = vpack.c.bf16 %v1182_v24, %v1182_v24 }
 0x74e   : > { %1662 = vmatmul.mubr.msk.bf16.vlgmr.msra.gmra.mrb[20].mxu0 %vm556_vm1, %v1183_v25 }
 0x821   : > { %v1244_v29 = vpop.f32.mrb[20].mxu0 }
 0x822   : > { %v1245_v30 = vadd.f32 %v1543_v28, %v1244_v29  ;;  %v1663_v31 = vpop.f32.mrb[21].mxu0 }
 0x823   : > { %v1247_v32 = vpop.f32.mrb[22].mxu0 }
 0x824   : > { %v1250_v33 = vmax.f32 %v1245_v30, 0.0  ;;  %v1664_v34 = vpop.f32.mrb[23].mxu0 }
 0x826   : > { %v1251_v35 = vpack.c.bf16 %v1250_v33, %v1250_v33 }
 0x828   : > { %1674 = vmatmul.mubr.msk.bf16.vlgmr.msra.gmra.mrb[20].mxu1 %vm1291_vm7, %v1251_v35 }
 0x8fb   : > { %v1329_v36 = vpop.f32.mrb[20].mxu1 }
 0x8fc   : > { %v1330_v37 = vadd.f32 %v1547_v0, %v1329_v36  ;;  %v1675_v38 = vpop.f32.mrb[21].mxu1 }
 0x8fd   : > { %v1332_v39 = vpop.f32.mrb[22].mxu1 }
 0x8fe   : > { %v1676_v40 = vpop.f32.mrb[23].mxu1  ;;  %v1335_v41 = vadd.f32 %v1330_v37, %v1182_v24 }
 0x900   : > { %v1336_v42 = vsel %vm556_vm1, %v1335_v41, 0.0 }
 0x901   : > { %1337 = vadd.xlane.f32.xlu0 %v1336_v42 }
 0x98e   : > { %v1338_v43 = vpop.xlane.xlu0 %1337 }
 0x98f   : > { %v1339_v44 = vmul.f32 0.03125, %v1338_v43 }
 0x991   : > { %v1340_v45 = vsub.f32 %v1335_v41, %v1339_v44 }
 0x993   : > { %v1341_v46 = vmul.f32 %v1340_v45, %v1340_v45 }
 0x995   : > { %v1342_v47 = vsel %vm556_vm1, %v1341_v46, 0.0 }
 0x996   : > { %1343 = vadd.xlane.f32.xlu0 %v1342_v47 }
 0x997   : > { %1822 = shalt.err (!%p1819_p7)
}
 0x998   : > { %s1823_s25 = scalar_lea.hbm %s2263_s27, 512  ;;  %s1827_s23 = scalar_lea.hbm %s2360_s15, 1024 }
 0x999   : > { %p1824_p8 = scmp.ne.s32.totalorder %s2263_s27, %s1823_s25  ;;  %p1828_p1 = scmp.lt.u32.totalorder %s2263_s27, %s2360_s15 }
 0x99a   : > { %p1829_p0 = scmp.lt.u32.totalorder %s1827_s23, %s1823_s25  ;;  %p1831_p6 = scmp.lt.u32.totalorder %s1823_s25, %s2263_s27 }
 0x99b   : > { %p1825_p11 = pnand %p1824_p8, %p2386_p9 }
 0x99c   : > { %p1830_p5 = por %p1829_p0, %p1828_p1 }
 0x99d   : > { %p1826_p13 = pneg %p1825_p11 }
 0x99e   : > { %p1832_p10 = por %p1831_p6, %p1830_p5 }
 0x9a0   : > { %p1833_p12 = pnand %p1832_p10, %p1826_p13 }
 0x9a2   : > { %1836 = shalt.err (!%p1833_p12)
}
 0x9a3   : > { %s1929_s30 = smov 128   ;;  %s2387_s16 = smov 8   ;;  %v1553_v52 = vld [vmem:[%s2357_s12] ss:$0 sm:$0xff] }
 0x9a4   : > { %s2388_s0 = scalar_lea.sflag [#allocation8], %s2173_s17  ;;  %s1519_s29 = sshll.u32 %s2173_s17, 3  ;;  %v1554_v54 = vld [vmem:[%s2358_s13] ss:$0 sm:$0xff] }
 0x9a5   : > { %1682 = dma.vmem_to_hbm [thread:$0]  (%p2386_p9), %s2258_s24, 512, %s2263_s27, %s2388_s0, %s1929_s30, %s1929_s30, %s2387_s16  }
 0x9a6   : > { %s1557_s20 = sshll.u32 %s2032_s22, 7  ;;  %s515_s1 = scalar_lea.vmem [#allocation6], %s1519_s29 }
 0x9a7   : > { %s1385_s0 = sshll.u32 %s515_s1, 4  ;;  %s2301_s30 = scalar_lea.hbm %s2359_s14, %s1557_s20  ;;  %s2303_s0 = int_to_ptr.vmem [resolvable:$true] %s1385_s0 }
 0x9a8   : > { %s1367_s16 = scalar_lea.sflag [#allocation5], %s2173_s17  ;;  %s1837_s25 = scalar_lea.vmem %s2303_s0, 128 }
 0x9a9   : > { %p1838_p2 = scmp.ne.s32.totalorder %s2303_s0, %s1837_s25  ;;  %s1930_s22 = smov [#allocation6]  }
 0x9aa   : > { %s1841_s29 = sshll.u32 %s1930_s22, 4  ;;  %s1842_s29 = int_to_ptr.vmem [resolvable:$false] %s1841_s29 }
 0x9ab   : > { %p1839_p3 = pnand %p1838_p2, %p2386_p9  ;;  %s1843_s26 = scalar_lea.vmem %s1842_s29, 256 }
 0x9ac   : > { %p1844_p7 = scmp.lt.s32.totalorder %s2303_s0, %s1842_s29  ;;  %p1845_p8 = scmp.lt.s32.totalorder %s1843_s26, %s1837_s25 }
 0x9ad   : > { %p1840_p4 = pneg %p1839_p3 }
 0x9ae   : > { %p1846_p11 = por %p1845_p8, %p1844_p7 }
 0x9b0   : > { %p1847_p13 = pnand %p1846_p11, %p1840_p4 }
 0xa23   : > { %v1344_v48 = vpop.xlane.xlu0 %1343 }
 0xa24   : > { %v1345_v49 = vmul.f32 0.03125, %v1344_v48 }
 0xa26   : > { %v1346_v50 = vadd.f32 1e-05, %v1345_v49 }
 0xa28   : > { %1779 = vrsqrt.f32 %v1346_v50 }
 0xa32   : > { %v1780_v51 = vpop.eup %1779 }
 0xa33   : > { %v1348_v53 = vmul.f32 %v1780_v51, %v1340_v45 }
 0xa35   : > { %v1356_v55 = vmul.f32 %v1553_v52, %v1348_v53 }
 0xa37   : > { %v1364_v56 = vadd.f32 %v1554_v54, %v1356_v55 }
 0xa39   : > { %1365 = vst.msk [vmem:[%s515_s1] sm:$0xff] %vm556_vm1, %v1364_v56 }
 0xa3a   : > { %1850 = shalt.err (!%p1847_p13)
}
 0xa3b   : > { %s1851_s1 = scalar_lea.hbm %s2301_s30, 128  ;;  %s1855_s23 = scalar_lea.hbm %s2359_s14, 256 }
 0xa3c   : > { %p1852_p1 = scmp.ne.s32.totalorder %s2301_s30, %s1851_s1  ;;  %p1856_p6 = scmp.lt.u32.totalorder %s2301_s30, %s2359_s14 }
 0xa3d   : > { %p1857_p10 = scmp.lt.u32.totalorder %s1855_s23, %s1851_s1  ;;  %p1859_p2 = scmp.lt.u32.totalorder %s1851_s1, %s2301_s30 }
 0xa3e   : > { %p1853_p0 = pnand %p1852_p1, %p2386_p9 }
 0xa3f   : > { %p1858_p12 = por %p1857_p10, %p1856_p6 }
 0xa40   : > { %p1854_p5 = pneg %p1853_p0 }
 0xa41   : > { %p1860_p3 = por %p1859_p2, %p1858_p12 }
 0xa43   : > { %p1861_p4 = pnand %p1860_p3, %p1854_p5 }
 0xa45   : > { %1864 = shalt.err (!%p1861_p4)
}
 0xa46   : > { %1681 = dma.vmem_to_hbm [thread:$0]  (%p2386_p9), %s2303_s0, 128, %s2301_s30, %s1367_s16  }
 0xa47 PF: > { %s2389_s27 = sld [smem:[#allocation12_spill]]  ;;  %s2390_s25 = sld [smem:[#allocation16_spill]] }
 0xa48   : > { %p1698_p7 = scmp.ge.s32.totalorder %s1907_s21, 2 }
 0xa4d   : > { %s1413_s22 = sand.u32 1, %s2389_s27   ;;  %p2391_p8 = scmp.ne.s32.totalorder %s2390_s25, 0 }
 0xa4e   : > { %s1414_s29 = scalar_lea.sflag [#allocation5], %s1413_s22 }
 0xa4f   : > { %p1690_p11 = pnand %p1698_p7, %p2391_p8 }
 0xa51   : > { %1886 = dma.done.wait (!%p1690_p11), %s1414_s29, 128  }
 0xa52   : > { %1888 = vsyncadd (!%p1690_p11), %s1414_s29, 4294967168  ;;  %s1423_s26 = scalar_lea.sflag [#allocation8], %s1413_s22 }
 0xa53   : > { %1890 = dma.done.wait (!%p1690_p11), %s1423_s26, 512  }
 0xa54   : > { %1892 = vsyncadd (!%p1690_p11), %s1423_s26, 4294966784  ;;  %s2392_s21 = sld [smem:[#allocation14_spill]]  ;;  %s2393_s28 = sld [smem:[#allocation13_spill]] }
 0xa55   : > { %s2394_s20 = sld [smem:[#allocation15_spill]]  ;;  %s2395_s18 = smov %s1899_s19 }
 0xa5a   : > { %p30_p9 = scmp.ge.s32.totalorder %s2392_s21, 4   ;;  %s2396_s19 = smov %s2393_s28 }
 0xa5c   :  { %32 = sbr.rel (!%p30_p9) target bundleno = 9 (0x9), region = 139 }
 0xa63   :  { %1428 = vsyncpa [#allocation4], 1 }
 0xa64   :  { %1430 = vsyncpa [#allocation4 + $0x1], 1 }
 0xa65   :  { %1431 = vsyncpa [#allocation5], 1 }
 0xa66   :  { %1433 = vsyncpa [#allocation5 + $0x1], 1 }
 0xa67   :  { %1434 = vsyncpa [#allocation8], 1 }
 0xa68   :  { %1436 = vsyncpa [#allocation8 + $0x1], 1 }

</bundles_post_ra>
